<compile_context>
chip_gen: v5e
topology: v5e:2x2
jax: 0.10.0
libtpu: 0.0.40
codegen_flags: <defaults>
</compile_context>

<pallas_src>
import jax
import jax.numpy as jnp
from jax.experimental import pallas as pl
from jax.experimental.pallas import tpu as pltpu


def e2e_kernel(a_ref, w1_ref, w2_ref, bias_ref, ttile_ref, trep_ref,
               out_ref, at_ref):
    # a_ref     : (C_in*N, N)     rows = (c, i) flattened, cols = j   (A, row-major)
    # w1_ref    : (C_out, C_in*N) cols = (c, i)
    # w2_ref    : (C_out, C_in*N) cols = (c, j)
    # bias_ref  : (C_out, 1)      combined bias b1 + b2
    # ttile_ref : (N, N*N)  const: ttile[j, i*N+j] = 1   ("tile a along i")
    # trep_ref  : (N, N*N)  const: trep[i, i*N+j]  = 1   ("repeat b along j")
    # out_ref   : (C_out, N*N)    lane-dense output slab
    # at_ref    : (C_in*N, N)     VMEM scratch: A with last two dims transposed
    cn, n = a_ref.shape
    c_in = cn // n

    # a[o, j] = sum_{c,i} W1[o,(c,i)] * A[(c,i), j]  + (b1[o] + b2[o])
    a = jnp.dot(w1_ref[...], a_ref[...], preferred_element_type=jnp.float32)
    a = a + bias_ref[...]                                  # fold bias once, (C_out, N)

    # Build A^T per channel in VMEM (XLU transposes; no second HBM read of A):
    #   at[(c, j), i] = A[(c, i), j]
    for c in range(c_in):                                  # static, unrolled
        at_ref[pl.ds(c * n, n), :] = a_ref[pl.ds(c * n, n), :].T

    # b[o, i] = sum_{c,j} W2[o,(c,j)] * A[(c,i), j]
    b = jnp.dot(w2_ref[...], at_ref[...], preferred_element_type=jnp.float32)

    # Lane-dense expansion on the MXU: out[o, i*N + j] = a[o, j] + b[o, i]
    out = (jnp.dot(a, ttile_ref[...], preferred_element_type=jnp.float32)
           + jnp.dot(b, trep_ref[...], preferred_element_type=jnp.float32))
    out_ref[...] = out.astype(out_ref.dtype)


def e2e_forward(A, W1, W2, b1, b2):
    """A: (1, C_in, N, N); W1: (C_out, C_in, N, 1); W2: (C_out, C_in, 1, N)."""
    _, C_in, N, _ = A.shape
    C_out = W1.shape[0]

    # Metadata-only reshapes / tiny constants in XLA; no extra HBM copy of A.
    a_flat = A.reshape(C_in * N, N)                              # rows=(c,i), cols=j
    w1_flat = W1[:, :, :, 0].reshape(C_out, C_in * N)            # cols=(c,i)
    w2_flat = W2[:, :, 0, :].reshape(C_out, C_in * N)            # cols=(c,j)
    bias = (b1 + b2).astype(jnp.float32).reshape(C_out, 1)

    # Constant 0/1 selector matrices for the lane-dense expansion
    # (N^2 * N elements each; constant-folded by XLA.  Tile over j for huge N.)
    eye = jnp.eye(N, dtype=jnp.float32)
    t_tile = jnp.tile(eye, (1, N))                               # [j, i*N+j] = 1
    t_rep = jnp.repeat(eye, N, axis=1)                           # [i, i*N+j] = 1

    vmem = pl.BlockSpec(memory_space=pltpu.MemorySpace.VMEM)
    out_flat = pl.pallas_call(
        e2e_kernel,
        out_shape=jax.ShapeDtypeStruct((C_out, N * N), A.dtype),
        in_specs=[vmem] * 6,
        out_specs=vmem,
        scratch_shapes=[pltpu.VMEM((C_in * N, N), jnp.float32)],
    )(a_flat, w1_flat, w2_flat, bias, t_tile, t_rep)

    return out_flat.reshape(1, C_out, N, N)                      # free reshape


def e2e_reference(A, W1, W2, b1, b2):
    # Pure-JAX reference of the same math (for the correctness check).
    A3 = A[0]
    a = jnp.einsum("cij,oci->oj", A3, W1[:, :, :, 0]) + b1[:, None]   # (C_out, N)
    b = jnp.einsum("cij,ocj->oi", A3, W2[:, :, 0, :]) + b2[:, None]   # (C_out, N)
    return (a[:, None, :] + b[:, :, None])[None]


if __name__ == "__main__":
    # Small, self-consistent shapes: the module's concat + add requires
    # d == input_shape[0] == nodes, so N = d.
    in_channel = 4
    out_channel = 8
    nodes = 16          # == d

    key = jax.random.PRNGKey(0)
    k_a, k_w1, k_w2, k_b1, k_b2 = jax.random.split(key, 5)

    A = jax.random.normal(k_a, (1, in_channel, nodes, nodes), dtype=jnp.float32)
    W1 = jax.random.normal(k_w1, (out_channel, in_channel, nodes, 1),
                           dtype=jnp.float32) * 0.1
    W2 = jax.random.normal(k_w2, (out_channel, in_channel, 1, nodes),
                           dtype=jnp.float32) * 0.1
    b1 = jax.random.normal(k_b1, (out_channel,), dtype=jnp.float32) * 0.1
    b2 = jax.random.normal(k_b2, (out_channel,), dtype=jnp.float32) * 0.1

    out = jax.block_until_ready(e2e_forward(A, W1, W2, b1, b2))
    ref = jax.block_until_ready(e2e_reference(A, W1, W2, b1, b2))

    assert out.shape == (1, out_channel, nodes, nodes)
    assert jnp.allclose(out, ref, atol=1e-4, rtol=1e-4)

    print("KERNEL_OK")
</pallas_src>

<mosaic_0001>
module attributes {stable_mosaic.version = 11 : i64} {
  func.func @e2e_kernel(%arg0: memref<64x16xf32, #tpu.memory_space<vmem>>, %arg1: memref<8x64xf32, #tpu.memory_space<vmem>>, %arg2: memref<8x64xf32, #tpu.memory_space<vmem>>, %arg3: memref<8x1xf32, #tpu.memory_space<vmem>>, %arg4: memref<16x256xf32, #tpu.memory_space<vmem>>, %arg5: memref<16x256xf32, #tpu.memory_space<vmem>>, %arg6: memref<8x256xf32, #tpu.memory_space<vmem>>, %arg7: memref<64x16xf32, #tpu.memory_space<vmem>>) attributes {dimension_semantics = [], scalar_prefetch = 0 : i64, scratch_operands = 1 : i64, tpu.core_type = #tpu.core_type<tc>} {
    %c0 = arith.constant 0 : index
    %c0_0 = arith.constant 0 : index
    %0 = vector.load %arg1[%c0, %c0_0] : memref<8x64xf32, #tpu.memory_space<vmem>>, vector<8x64xf32>
    %c0_1 = arith.constant 0 : index
    %c0_2 = arith.constant 0 : index
    %1 = vector.load %arg0[%c0_1, %c0_2] : memref<64x16xf32, #tpu.memory_space<vmem>>, vector<64x16xf32>
    %cst = arith.constant dense<0.000000e+00> : vector<8x16xf32>
    %2 = tpu.matmul %0, %1, %cst {dimension_numbers = #tpu.dot_dimension_numbers<[1], [0], [0], [1], [0, 0, 1, 1], [], []>} : vector<8x64xf32>, vector<64x16xf32>, vector<8x16xf32> -> vector<8x16xf32>
    %c0_3 = arith.constant 0 : index
    %c0_4 = arith.constant 0 : index
    %3 = vector.load %arg3[%c0_3, %c0_4] : memref<8x1xf32, #tpu.memory_space<vmem>>, vector<8x1xf32>
    %4 = vector.broadcast %3 : vector<8x1xf32> to vector<8x16xf32>
    %5 = arith.addf %2, %4 : vector<8x16xf32>
    %c0_5 = arith.constant 0 : index
    %c0_6 = arith.constant 0 : index
    %6 = vector.load %arg0[%c0_5, %c0_6] : memref<64x16xf32, #tpu.memory_space<vmem>>, vector<16x16xf32>
    %7 = tpu.transpose %6, [1, 0] : vector<16x16xf32> -> vector<16x16xf32>
    %c0_7 = arith.constant 0 : index
    %c0_8 = arith.constant 0 : index
    %8 = vector.load %arg7[%c0_7, %c0_8] : memref<64x16xf32, #tpu.memory_space<vmem>>, vector<16x16xf32>
    tpu.vector_store %arg7[%c0_7, %c0_8], %7 {strides = array<i32>} : memref<64x16xf32, #tpu.memory_space<vmem>>, vector<16x16xf32>,
    %c16 = arith.constant 16 : index
    %c0_9 = arith.constant 0 : index
    %9 = vector.load %arg0[%c16, %c0_9] : memref<64x16xf32, #tpu.memory_space<vmem>>, vector<16x16xf32>
    %10 = tpu.transpose %9, [1, 0] : vector<16x16xf32> -> vector<16x16xf32>
    %c16_10 = arith.constant 16 : index
    %c0_11 = arith.constant 0 : index
    %11 = vector.load %arg7[%c16_10, %c0_11] : memref<64x16xf32, #tpu.memory_space<vmem>>, vector<16x16xf32>
    tpu.vector_store %arg7[%c16_10, %c0_11], %10 {strides = array<i32>} : memref<64x16xf32, #tpu.memory_space<vmem>>, vector<16x16xf32>,
    %c32 = arith.constant 32 : index
    %c0_12 = arith.constant 0 : index
    %12 = vector.load %arg0[%c32, %c0_12] : memref<64x16xf32, #tpu.memory_space<vmem>>, vector<16x16xf32>
    %13 = tpu.transpose %12, [1, 0] : vector<16x16xf32> -> vector<16x16xf32>
    %c32_13 = arith.constant 32 : index
    %c0_14 = arith.constant 0 : index
    %14 = vector.load %arg7[%c32_13, %c0_14] : memref<64x16xf32, #tpu.memory_space<vmem>>, vector<16x16xf32>
    tpu.vector_store %arg7[%c32_13, %c0_14], %13 {strides = array<i32>} : memref<64x16xf32, #tpu.memory_space<vmem>>, vector<16x16xf32>,
    %c48 = arith.constant 48 : index
    %c0_15 = arith.constant 0 : index
    %15 = vector.load %arg0[%c48, %c0_15] : memref<64x16xf32, #tpu.memory_space<vmem>>, vector<16x16xf32>
    %16 = tpu.transpose %15, [1, 0] : vector<16x16xf32> -> vector<16x16xf32>
    %c48_16 = arith.constant 48 : index
    %c0_17 = arith.constant 0 : index
    %17 = vector.load %arg7[%c48_16, %c0_17] : memref<64x16xf32, #tpu.memory_space<vmem>>, vector<16x16xf32>
    tpu.vector_store %arg7[%c48_16, %c0_17], %16 {strides = array<i32>} : memref<64x16xf32, #tpu.memory_space<vmem>>, vector<16x16xf32>,
    %c0_18 = arith.constant 0 : index
    %c0_19 = arith.constant 0 : index
    %18 = vector.load %arg2[%c0_18, %c0_19] : memref<8x64xf32, #tpu.memory_space<vmem>>, vector<8x64xf32>
    %c0_20 = arith.constant 0 : index
    %c0_21 = arith.constant 0 : index
    %19 = vector.load %arg7[%c0_20, %c0_21] : memref<64x16xf32, #tpu.memory_space<vmem>>, vector<64x16xf32>
    %cst_22 = arith.constant dense<0.000000e+00> : vector<8x16xf32>
    %20 = tpu.matmul %18, %19, %cst_22 {dimension_numbers = #tpu.dot_dimension_numbers<[1], [0], [0], [1], [0, 0, 1, 1], [], []>} : vector<8x64xf32>, vector<64x16xf32>, vector<8x16xf32> -> vector<8x16xf32>
    %c0_23 = arith.constant 0 : index
    %c0_24 = arith.constant 0 : index
    %21 = vector.load %arg4[%c0_23, %c0_24] : memref<16x256xf32, #tpu.memory_space<vmem>>, vector<16x256xf32>
    %cst_25 = arith.constant dense<0.000000e+00> : vector<8x256xf32>
    %22 = tpu.matmul %5, %21, %cst_25 {dimension_numbers = #tpu.dot_dimension_numbers<[1], [0], [0], [1], [0, 0, 1, 1], [], []>} : vector<8x16xf32>, vector<16x256xf32>, vector<8x256xf32> -> vector<8x256xf32>
    %c0_26 = arith.constant 0 : index
    %c0_27 = arith.constant 0 : index
    %23 = vector.load %arg5[%c0_26, %c0_27] : memref<16x256xf32, #tpu.memory_space<vmem>>, vector<16x256xf32>
    %cst_28 = arith.constant dense<0.000000e+00> : vector<8x256xf32>
    %24 = tpu.matmul %20, %23, %cst_28 {dimension_numbers = #tpu.dot_dimension_numbers<[1], [0], [0], [1], [0, 0, 1, 1], [], []>} : vector<8x16xf32>, vector<16x256xf32>, vector<8x256xf32> -> vector<8x256xf32>
    %25 = arith.addf %22, %24 : vector<8x256xf32>
    %c0_29 = arith.constant 0 : index
    %c0_30 = arith.constant 0 : index
    %26 = vector.load %arg6[%c0_29, %c0_30] : memref<8x256xf32, #tpu.memory_space<vmem>>, vector<8x256xf32>
    tpu.vector_store %arg6[%c0_29, %c0_30], %25 {strides = array<i32>} : memref<8x256xf32, #tpu.memory_space<vmem>>, vector<8x256xf32>,
    return
  }
}

</mosaic_0001>

<bundles_post_ra>
// kernel: tpu_custom_call.1
= control target key start
LH: loop header
LB: loop body
LE: loop exit
PB: predicated region body
PF: predicated region fallthrough
CT: control target
= control target key end

     0   :  { %s500_s0 = inlined_call_operand.vmem [shape: f32[64,16], index: 0, kind: input, shape index: {}]   ;;  %s501_s1 = inlined_call_operand.vmem [shape: f32[8,64], index: 1, kind: input, shape index: {}]   ;;  %s502_s2 = inlined_call_operand.vmem [shape: f32[8,64], index: 2, kind: input, shape index: {}]   ;;  %s503_s3 = inlined_call_operand.vmem [shape: f32[8,1], index: 3, kind: input, shape index: {}]   ;;  %s504_s4 = inlined_call_operand.vmem [shape: f32[16,256], index: 4, kind: input, shape index: {}]   ;;  %s505_s5 = inlined_call_operand.vmem [shape: f32[16,256], index: 5, kind: input, shape index: {}]   ;;  %s506_s6 = inlined_call_operand.hbm [shape: f32[8,256], index: 6, kind: output, shape index: {}]  }
   0x1   :  { %v172_v0 = vld [vmem:[%s500_s0 + $0x30] sm:$0xff]  ;;  %v136_v1 = vld [vmem:[%s500_s0 + $0x20] sm:$0xff]  ;;  %v173_v2 = vld [vmem:[%s500_s0 + $0x38] sm:$0xff] }
   0x2   :  { %174 = vxpose.xlu0.b32.start [1/2] (short) (narrow) %v172_v0, 16  ;;  %138 = vxpose.xlu1.b32.start [1/2] (short) (narrow) %v136_v1, 16  ;;  %v100_v3 = vld [vmem:[%s500_s0 + $0x10] sm:$0xff] }
   0x3   :  { %102 = vxpose.xlu2.b32.start [1/2] (short) (narrow) %v100_v3, 16  ;;  %51 = vmatpush.msra.mxu0 %v173_v2 }
   0x4   :  { %11 = vsyncpa [#allocation4], 0  ;;  %v137_v4 = vld [vmem:[%s500_s0 + $0x28] sm:$0xff]  ;;  %v101_v5 = vld [vmem:[%s500_s0 + $0x18] sm:$0xff]  ;;  %vm97_vm0 = vcmask 130048   ;;  %vm39_vm1 = vcmask 523264  }
   0x5   :  { %52 = vmatpush.msra.mxu0 %v172_v0  ;;  %v64_v6 = vld [vmem:[%s500_s0 + $0x8] sm:$0xff]  ;;  %v63_v7 = vld [vmem:[%s500_s0] sm:$0xff]  ;;  %v246_v14 = vld [vmem:[%s505_s5 + $0x10] sm:$0xff]  ;;  %v389_v15 = vmov 0   ;;  %s343_s9 = sshll.u32 %s506_s6, 4  ;;  %s344_s9 = int_to_ptr.hbm [resolvable:$true] %s343_s9 }
   0x6   :  { %v24_v12 = vld [vmem:[%s501_s1] sm:$0xff]  ;;  %v247_v16 = vld [vmem:[%s505_s5 + $0x18] sm:$0xff]  ;;  %265 = vmatpush.msra.mxu2 %v246_v14  ;;  %v245_v31 = vld [vmem:[%s505_s5 + $0x8] sm:$0xff] }
   0x7   :  { %53 = vmatpush.msra.mxu0 %v137_v4  ;;  %v33_v13 = vld [vmem:[%s503_s3] sm:$0xff]  ;;  %285 = vmatpush.msra.mxu3 %v247_v16  ;;  %v242_v32 = vld [vmem:[%s504_s4 + $0x10] sm:$0xff]  ;;  %v243_v33 = vld [vmem:[%s504_s4 + $0x18] sm:$0xff] }
   0x8   :  { %v208_v28 = vld [vmem:[%s502_s2] sm:$0xff]  ;;  %v241_v35 = vld [vmem:[%s504_s4 + $0x8] sm:$0xff] }
   0x9   :  { %54 = vmatpush.msra.mxu0 %v136_v1  ;;  %v244_v30 = vld [vmem:[%s505_s5] sm:$0xff]  ;;  %286 = vmatpush.msra.mxu3 %v245_v31  ;;  %s390_s5 = smov [#allocation3]  }
   0xa   :  { %175 = vxpose.xlu0.b32.end [2/2] (short) (narrow) %v173_v2, 16  ;;  %139 = vxpose.xlu1.b32.end [2/2] (short) (narrow) %v137_v4, 16  ;;  %v240_v34 = vld [vmem:[%s504_s4] sm:$0xff]  ;;  %s341_s7 = sshll.u32 %s390_s5, 4  ;;  %s342_s7 = int_to_ptr.vmem [resolvable:$true] %s341_s7 }
   0xb   :  { %103 = vxpose.xlu2.b32.end [2/2] (short) (narrow) %v101_v5, 16  ;;  %55 = vmatpush.msra.mxu0 %v101_v5 }
   0xc   :  { %266 = vmatpush.msra.mxu2 %v244_v30  ;;  %328 = vmatpush.msrb.mxu3 %v243_v33 }
   0xd   :  { %56 = vmatpush.msra.mxu0 %v100_v3 }
   0xe   :  { %308 = vmatpush.msrb.mxu2 %v242_v32  ;;  %329 = vmatpush.msrb.mxu3 %v241_v35 }
   0xf   :  { %57 = vmatpush.msra.mxu0 %v64_v6 }
  0x10   :  { %309 = vmatpush.msrb.mxu2 %v240_v34 }
  0x11   :  { %58 = vmatpush.msra.mxu0 %v63_v7 }
  0x12   :  { %65 = vxpose.xlu0.b32.start [1/2] (short) (narrow) %v63_v7, 16  ;;  %352 = vmatmul.msk.f32.vlgmr.msra.gmra.mxu0 %vm39_vm1, %v24_v12 }
  0x1a   :  { %66 = vxpose.xlu0.b32.end [2/2] (short) (narrow) %v64_v6, 16 }
  0x5d   :  { %361 = vset.pattern.permute.xlu1 %v389_v15 }
  0x64   :  { %36 = vperm.xlu1 %361, %v33_v13  }
  0x81   :  { %362 = vset.pattern.permute.xlu0 %v389_v15 }
  0x8f   :  { %v60_v38 = vpop.f32.mrf.mxu0 }
  0x9c   :  { %v118_v8 = vpop.trf.xlu2 }
  0x9d   :  { %134 = vst.msk [vmem:[#allocation2 + $0x10] sm:$0xff] %vm97_vm0, %v118_v8 }
  0xa4   :  { %v119_v9 = vpop.trf.xlu2  ;;  %v211_v26 = vld [vmem:[#allocation2 + $0x10] sm:$0xff] }
  0xa5   :  { %135 = vst.msk [vmem:[#allocation2 + $0x18] sm:$0xff] %vm97_vm0, %v119_v9 }
  0xa6   :  { %v190_v10 = vpop.trf.xlu0  ;;  %v154_v11 = vpop.trf.xlu1 }
  0xa7   :  { %206 = vst.msk [vmem:[#allocation2 + $0x30] sm:$0xff] %vm97_vm0, %v190_v10 }
  0xa8   :  { %170 = vst.msk [vmem:[#allocation2 + $0x20] sm:$0xff] %vm97_vm0, %v154_v11 }
  0xac   :  { %v212_v24 = vld [vmem:[#allocation2 + $0x18] sm:$0xff] }
  0xae   :  { %v191_v17 = vpop.trf.xlu0  ;;  %v155_v18 = vpop.trf.xlu1  ;;  %v215_v21 = vld [vmem:[#allocation2 + $0x30] sm:$0xff] }
  0xaf   :  { %207 = vst.msk [vmem:[#allocation2 + $0x38] sm:$0xff] %vm97_vm0, %v191_v17  ;;  %v213_v23 = vld [vmem:[#allocation2 + $0x20] sm:$0xff] }
  0xb0   :  { %171 = vst.msk [vmem:[#allocation2 + $0x28] sm:$0xff] %vm97_vm0, %v155_v18 }
  0xb6   :  { %v81_v19 = vpop.trf.xlu0  ;;  %v216_v20 = vld [vmem:[#allocation2 + $0x38] sm:$0xff] }
  0xb7   :  { %98 = vst.msk [vmem:[#allocation2] sm:$0xff] %vm97_vm0, %v81_v19  ;;  %228 = vmatpush.msra.mxu1 %v216_v20  ;;  %v214_v22 = vld [vmem:[#allocation2 + $0x28] sm:$0xff] }
  0xb9   :  { %229 = vmatpush.msra.mxu1 %v215_v21 }
  0xbb   :  { %230 = vmatpush.msra.mxu1 %v214_v22 }
  0xbd   :  { %231 = vmatpush.msra.mxu1 %v213_v23 }
  0xbe   :  { %v82_v25 = vpop.trf.xlu0  ;;  %v209_v29 = vld [vmem:[#allocation2] sm:$0xff] }
  0xbf   :  { %99 = vst.msk [vmem:[#allocation2 + $0x8] sm:$0xff] %vm97_vm0, %v82_v25  ;;  %232 = vmatpush.msra.mxu1 %v212_v24 }
  0xc1   :  { %233 = vmatpush.msra.mxu1 %v211_v26 }
  0xc6   :  { %v210_v27 = vld [vmem:[#allocation2 + $0x8] sm:$0xff] }
  0xc7   :  { %234 = vmatpush.msra.mxu1 %v210_v27 }
  0xc9   :  { %235 = vmatpush.msra.mxu1 %v209_v29 }
  0xca   :  { %353 = vmatmul.msk.f32.vlgmr.msra.gmra.mxu1 %vm39_vm1, %v208_v28 }
  0xd6   :  { %v37_v37 = vpop.permute.xlu1 %36 }
  0xd7   :  { %v61_v39 = vadd.f32 %v60_v38, %v37_v37 }
 0x147   :  { %v237_v36 = vpop.f32.mrf.mxu1 }
 0x148   :  { %354 = vmatmul.msk.f32.vlgmr.msra.gmra.mxu2 %vm97_vm0, %v237_v36  ;;  %355 = vmatmul.msk.f32.vlgmr.msra.gmra.mxu3 %vm97_vm0, %v237_v36 }
 0x150   :  { %356 = vmatmul.msk.f32.vlgmr.msrb.gmra.mxu2 %vm97_vm0, %v61_v39  ;;  %357 = vmatmul.msk.f32.vlgmr.msrb.gmra.mxu3 %vm97_vm0, %v61_v39 }
 0x1cb   :  { %v268_v40 = vpop.f32.mrf.mxu2  ;;  %v288_v41 = vpop.f32.mrf.mxu3 }
 0x1d3   :  { %v311_v42 = vpop.f32.mrf.mxu2  ;;  %v331_v43 = vpop.f32.mrf.mxu3 }
 0x1d4   :  { %v312_v44 = vadd.f32 %v311_v42, %v268_v40  ;;  %v332_v45 = vadd.f32 %v331_v43, %v288_v41 }
 0x1d6   :  { %334 = vst [vmem:[#allocation3] sm:$0xff] %v312_v44 }
 0x1d7   :  { %335 = vst [vmem:[#allocation3 + $0x8] sm:$0xff] %v332_v45 }
 0x1d8   :  { %346 = dma.vmem_to_hbm [thread:$0]  %s342_s7, 256, %s344_s9, [#allocation4]  }
 0x1d9   :  { %387 = dma.done.wait [#allocation4], 256  }
 0x1da   :  { %388 = vsyncadd [#allocation4], 4294967040 }
 0x1db   :  { %351 = vsyncpa [#allocation4], 1 }

</bundles_post_ra>
